<compile_context>
chip_gen: v7x
topology: tpu7x:2x2x1
jax: 0.10.0
libtpu: 0.0.40
codegen_flags: <defaults>
</compile_context>

<pallas_src>
import functools

import jax
import jax.numpy as jnp
from jax.experimental import pallas as pl
from jax.experimental.pallas import tpu as pltpu


_VMEM_LIMIT_BYTES = 48 * 1024 * 1024     # < v7x 64 MiB physical, ample on v5e/v6e
_TARGET_BLOCK_BYTES = 4 * 1024 * 1024    # ~4 MiB per input block
_MAX_LANE_TILE = 8192                    # column-tile width (multiple of 128)


def _sublane_multiple(itemsize):
    """Row-count packing multiple: 8 for f32, 16 for bf16, 32 for int8/fp8."""
    return max(8, 32 // int(itemsize))


def _padded_row_bytes(bm, itemsize):
    """Physical bytes of one row of a (*, bm) tile (lanes padded to 128)."""
    lanes = -(-bm // 128) * 128
    return lanes * int(itemsize)


def _pick_block_cols(m):
    """Column (lane) tile: whole C*H if small, else 8192-lane tiles."""
    return int(m) if m <= _MAX_LANE_TILE else _MAX_LANE_TILE


def _pick_block_rows(n_rows, row_bytes, sub):
    """Rows per block: multiple of `sub`, ~4 MiB target, >=2 blocks if possible."""
    if n_rows <= sub:
        return int(n_rows)
    bn = (_TARGET_BLOCK_BYTES // max(row_bytes, 1)) // sub * sub
    bn = int(max(sub, min(bn, n_rows)))
    # Prefer >= 2 row blocks so the "parallel" axis can shard across both
    # TensorCores on v7x (harmless single-TC elsewhere).
    if bn >= n_rows and n_rows >= 2 * sub:
        half = -(-n_rows // 2)
        bn = int(min(n_rows, -(-half // sub) * sub))
    return bn


# ---------------------------------------------------------------------------
# Data-dependent init: streaming sum / sum-of-squares over the lane-dense
# (N, C*H) view.  Outputs raw (1, C*H) sums; finalize happens in the wrapper.
# ---------------------------------------------------------------------------
def _init_kernel(x_ref, sum_ref, sq_ref, *, batch, block_rows):
    r = pl.program_id(1)                                     # row (reduction) axis, last

    @pl.when(r == 0)
    def _():
        sum_ref[...] = jnp.zeros_like(sum_ref)
        sq_ref[...] = jnp.zeros_like(sq_ref)

    xs = x_ref[...].astype(jnp.float32)                      # (bn, bm), lane-dense
    if batch % block_rows != 0:
        # Mask padded rows of the ragged last row-block (static check).
        row = jax.lax.broadcasted_iota(jnp.int32, xs.shape, 0) + r * block_rows
        xs = jnp.where(row < batch, xs, 0.0)

    sum_ref[...] += jnp.sum(xs, axis=0, keepdims=True)       # sublane reduce, (1, bm)
    sq_ref[...] += jnp.sum(xs * xs, axis=0, keepdims=True)   # (1, bm)


def actnorm2d_initialize(x):
    """First-call data-dependent init.  Returns (loc, scale), each (1, C, 1) f32."""
    n, c, h = x.shape
    m = c * h
    x2 = x.reshape(n, m)                                     # free, contiguous reshape
    sub = _sublane_multiple(x.dtype.itemsize)
    bm = _pick_block_cols(m)
    bn = _pick_block_rows(n, _padded_row_bytes(bm, x.dtype.itemsize), sub)
    grid = (pl.cdiv(m, bm), pl.cdiv(n, bn))                  # reduction (rows) last

    kernel = functools.partial(_init_kernel, batch=n, block_rows=bn)
    s_row, sq_row = pl.pallas_call(
        kernel,
        out_shape=(jax.ShapeDtypeStruct((1, m), jnp.float32),
                   jax.ShapeDtypeStruct((1, m), jnp.float32)),
        grid=grid,
        in_specs=[pl.BlockSpec((bn, bm), lambda j, r: (r, j))],
        out_specs=(pl.BlockSpec((1, bm), lambda j, r: (0, j)),
                   pl.BlockSpec((1, bm), lambda j, r: (0, j))),
        compiler_params=pltpu.CompilerParams(
            dimension_semantics=("parallel", "arbitrary"),
            vmem_limit_bytes=_VMEM_LIMIT_BYTES),
    )(x2)

    # Finalize on tiny C-element vectors in plain JAX (no in-kernel epilogue).
    cnt = float(n * h)
    sum_c = s_row.reshape(c, h).sum(axis=1)
    sq_c = sq_row.reshape(c, h).sum(axis=1)
    mean = sum_c / cnt
    # Unbiased variance (ddof=1), matching torch.std.
    # TODO(synk): single-pass sum/sum-sq in f32 can cancel for huge N*H with a
    # large mean offset; switch to a two-pass centered reduction if needed.
    var = (sq_c - sum_c * mean) / max(cnt - 1.0, 1.0)
    std = jnp.sqrt(jnp.maximum(var, 0.0))
    loc = (-mean).reshape(1, c, 1)
    scale = (1.0 / (std + 1e-6)).reshape(1, c, 1)
    return loc, scale


# ---------------------------------------------------------------------------
# Forward: out = scale * (x + loc) = x * scale + (scale * loc)
# ---------------------------------------------------------------------------
def _forward_kernel(x_ref, p_ref, out_ref):
    scale = p_ref[0:1, :]                                    # (1, bm), resident params
    bias = p_ref[1:2, :]                                     # (1, bm) = scale * loc
    out_ref[...] = (x_ref[...].astype(jnp.float32) * scale + bias).astype(out_ref.dtype)


def _expand_params(loc, scale, c, h):
    """Build the (2, C*H) resident params block: row 0 = scale, row 1 = scale*loc."""
    loc_c = loc.reshape(c, 1).astype(jnp.float32)
    scale_c = scale.reshape(c, 1).astype(jnp.float32)
    scale_row = jnp.broadcast_to(scale_c, (c, h)).reshape(1, c * h)
    bias_row = jnp.broadcast_to(scale_c * loc_c, (c, h)).reshape(1, c * h)
    return jnp.concatenate([scale_row, bias_row], axis=0)


def actnorm2d_forward(x, params):
    n, c, h = x.shape
    m = c * h
    x2 = x.reshape(n, m)                                     # free, contiguous reshape
    sub = _sublane_multiple(x.dtype.itemsize)
    bm = _pick_block_cols(m)
    bn = _pick_block_rows(n, _padded_row_bytes(bm, x.dtype.itemsize), sub)
    grid = (pl.cdiv(n, bn), pl.cdiv(m, bm))

    out = pl.pallas_call(
        _forward_kernel,
        out_shape=jax.ShapeDtypeStruct((n, m), x.dtype),
        grid=grid,
        in_specs=[pl.BlockSpec((bn, bm), lambda i, j: (i, j)),
                  pl.BlockSpec((2, bm), lambda i, j: (0, j))],
        out_specs=pl.BlockSpec((bn, bm), lambda i, j: (i, j)),
        compiler_params=pltpu.CompilerParams(
            dimension_semantics=("parallel", "parallel"),
            vmem_limit_bytes=_VMEM_LIMIT_BYTES),
    )(x2, params)
    return out.reshape(n, c, h)


class ActNorm2D:
    """JAX/Pallas port of the PyTorch ActNorm2D forward pass."""

    def __init__(self, in_dim, logdet=True):
        self.in_dim = in_dim
        self.loc = jnp.zeros((1, in_dim, 1), jnp.float32)
        self.scale = jnp.ones((1, in_dim, 1), jnp.float32)
        self.initialized = 0      # the uint8 buffer becomes Python-side state
        self.logdet = logdet
        self._params = None       # cached (2, C*H) scale/bias block
        self._params_h = None

    def _get_params(self, h):
        if self._params is None or self._params_h != h:
            self._params = _expand_params(self.loc, self.scale, self.in_dim, h)
            self._params_h = h
        return self._params

    def __call__(self, x):
        # TODO(synk): Python-side init state is eager-only; under jax.jit the
        # branch is resolved at trace time — use functional state if jitted.
        _, _, h = x.shape
        if self.initialized == 0:
            self.loc, self.scale = actnorm2d_initialize(x)
            self.initialized = 1
            self._params = None
        params = self._get_params(h)
        out = actnorm2d_forward(x, params)
        if self.logdet:
            # C-element op: computed once in plain JAX, not inside the kernel.
            ld = h * jnp.sum(jnp.log(jnp.abs(self.scale)))
            return out, ld
        return out

    def reverse(self, output):
        # Simple elementwise inverse; kept in plain JAX (not part of forward spec).
        return output / self.scale - self.loc


if __name__ == "__main__":
    key = jax.random.PRNGKey(0)
    N, C, H = 2, 4, 16
    x = jax.random.normal(key, (N, C, H), dtype=jnp.float32) * 2.0 + 0.5

    model = ActNorm2D(C, logdet=True)
    out, logdet = model(x)
    out = jax.block_until_ready(out)
    logdet = jax.block_until_ready(logdet)

    # Pure-JAX reference of the PyTorch forward (first call includes data-dependent init).
    flat = jnp.transpose(x, (1, 0, 2)).reshape(C, -1)
    mean = flat.mean(axis=1)
    std = flat.std(axis=1, ddof=1)
    loc_r = (-mean).reshape(1, C, 1)
    scale_r = (1.0 / (std + 1e-6)).reshape(1, C, 1)
    out_r = scale_r * (x + loc_r)
    logdet_r = H * jnp.sum(jnp.log(jnp.abs(scale_r)))

    assert jnp.allclose(out, out_r, rtol=1e-4, atol=1e-5), "output mismatch"
    assert jnp.allclose(logdet, logdet_r, rtol=1e-4, atol=1e-5), "logdet mismatch"
    print("KERNEL_OK")
</pallas_src>

<mosaic_0001>
module attributes {stable_mosaic.version = 11 : i64} {
  func.func @_init_kernel(%arg0: i32, %arg1: i32, %arg2: memref<2x64xf32, #tpu.memory_space<vmem>>, %arg3: memref<1x64xf32, #tpu.memory_space<vmem>>, %arg4: memref<1x64xf32, #tpu.memory_space<vmem>>) attributes {dimension_semantics = [#tpu.dimension_semantics<parallel>, #tpu.dimension_semantics<arbitrary>], iteration_bounds = array<i64: 1, 1>, scalar_prefetch = 0 : i64, scratch_operands = 0 : i64, tpu.core_type = #tpu.core_type<tc>, window_params = [{transform_indices = @transform_0, window_bounds = array<i64: 2, 64>}, {transform_indices = @transform_1, window_bounds = array<i64: 1, 64>}, {transform_indices = @transform_2, window_bounds = array<i64: 1, 64>}]} {
    %c0_i32 = arith.constant 0 : i32
    %0 = arith.cmpi eq, %arg1, %c0_i32 : i32
    %1 = arith.extui %0 : i1 to i32
    %c0_i32_0 = arith.constant 0 : i32
    %2 = arith.cmpi ne, %1, %c0_i32_0 : i32
    scf.if %2 {
      %cst_11 = arith.constant 0.000000e+00 : f32
      %15 = vector.broadcast %cst_11 : f32 to vector<1x64xf32>
      %c0_12 = arith.constant 0 : index
      %c0_13 = arith.constant 0 : index
      %16 = vector.load %arg3[%c0_12, %c0_13] : memref<1x64xf32, #tpu.memory_space<vmem>>, vector<1x64xf32>
      tpu.vector_store %arg3[%c0_12, %c0_13], %15 {strides = array<i32>} : memref<1x64xf32, #tpu.memory_space<vmem>>, vector<1x64xf32>,
      %cst_14 = arith.constant 0.000000e+00 : f32
      %17 = vector.broadcast %cst_14 : f32 to vector<1x64xf32>
      %c0_15 = arith.constant 0 : index
      %c0_16 = arith.constant 0 : index
      %18 = vector.load %arg4[%c0_15, %c0_16] : memref<1x64xf32, #tpu.memory_space<vmem>>, vector<1x64xf32>
      tpu.vector_store %arg4[%c0_15, %c0_16], %17 {strides = array<i32>} : memref<1x64xf32, #tpu.memory_space<vmem>>, vector<1x64xf32>,
    } else {
    }
    %c0 = arith.constant 0 : index
    %c0_1 = arith.constant 0 : index
    %3 = vector.load %arg2[%c0, %c0_1] : memref<2x64xf32, #tpu.memory_space<vmem>>, vector<2x64xf32>
    %c0_2 = arith.constant 0 : index
    %c0_3 = arith.constant 0 : index
    %4 = vector.load %arg3[%c0_2, %c0_3] : memref<1x64xf32, #tpu.memory_space<vmem>>, vector<1x64xf32>
    %cst = arith.constant dense<0.000000e+00> : vector<64xf32>
    %5 = vector.multi_reduction <add>, %3, %cst [0] : vector<2x64xf32> to vector<64xf32>
    %6 = vector.shape_cast %5 : vector<64xf32> to vector<1x64xf32>
    %7 = arith.addf %4, %6 : vector<1x64xf32>
    %c0_4 = arith.constant 0 : index
    %c0_5 = arith.constant 0 : index
    %8 = vector.load %arg3[%c0_4, %c0_5] : memref<1x64xf32, #tpu.memory_space<vmem>>, vector<1x64xf32>
    tpu.vector_store %arg3[%c0_4, %c0_5], %7 {strides = array<i32>} : memref<1x64xf32, #tpu.memory_space<vmem>>, vector<1x64xf32>,
    %c0_6 = arith.constant 0 : index
    %c0_7 = arith.constant 0 : index
    %9 = vector.load %arg4[%c0_6, %c0_7] : memref<1x64xf32, #tpu.memory_space<vmem>>, vector<1x64xf32>
    %10 = arith.mulf %3, %3 : vector<2x64xf32>
    %cst_8 = arith.constant dense<0.000000e+00> : vector<64xf32>
    %11 = vector.multi_reduction <add>, %10, %cst_8 [0] : vector<2x64xf32> to vector<64xf32>
    %12 = vector.shape_cast %11 : vector<64xf32> to vector<1x64xf32>
    %13 = arith.addf %9, %12 : vector<1x64xf32>
    %c0_9 = arith.constant 0 : index
    %c0_10 = arith.constant 0 : index
    %14 = vector.load %arg4[%c0_9, %c0_10] : memref<1x64xf32, #tpu.memory_space<vmem>>, vector<1x64xf32>
    tpu.vector_store %arg4[%c0_9, %c0_10], %13 {strides = array<i32>} : memref<1x64xf32, #tpu.memory_space<vmem>>, vector<1x64xf32>,
    return
  }
  func.func @transform_0(%arg0: i32, %arg1: i32) -> (i32, i32) {
    %c0_i32 = arith.constant 0 : i32
    return %arg1, %arg0 : i32, i32
  }
  func.func @transform_1(%arg0: i32, %arg1: i32) -> (i32, i32) {
    %c0_i32 = arith.constant 0 : i32
    %c0_i32_0 = arith.constant 0 : i32
    return %c0_i32, %arg0 : i32, i32
  }
  func.func @transform_2(%arg0: i32, %arg1: i32) -> (i32, i32) {
    %c0_i32 = arith.constant 0 : i32
    %c0_i32_0 = arith.constant 0 : i32
    return %c0_i32, %arg0 : i32, i32
  }
}

</mosaic_0001>

<bundles_post_ra>
// kernel: tpu_custom_call.1
= control target key start
LH: loop header
LB: loop body
LE: loop exit
PB: predicated region body
PF: predicated region fallthrough
CT: control target
= control target key end

     0   :  { %8 = vsyncpa [#allocation3], 0  ;;  %s227_s0 = inlined_call_operand.hbm [shape: f32[2,64], index: 0, kind: input, shape index: {}]   ;;  %s228_s1 = inlined_call_operand.hbm [shape: f32[1,64], index: 1, kind: output, shape index: {0}]   ;;  %s229_s2 = inlined_call_operand.hbm [shape: f32[1,64], index: 2, kind: output, shape index: {1}]  }
   0x1   :  { %9 = vsyncpa [#allocation4], 0 }
   0x2   :  { %10 = vsyncpa [#allocation7], 0  ;;  %s160_s9 = smov [#allocation2]   ;;  %s88_s13 = scalar_lea.hbm %s227_s0, 32 }
   0x3   :  { %s17_s10 = sshll.u32 %s160_s9, 4  ;;  %p89_p0 = scmp.ne.s32.totalorder %s227_s0, %s88_s13  ;;  %s18_s10 = int_to_ptr.vmem [resolvable:$true] %s17_s10 }
   0x4   :  { %p92_p1 = scmp.lt.u32.totalorder %s88_s13, %s227_s0 }
   0x6   :  { %p94_p2 = pnand %p92_p1, %p89_p0 }
   0x8   :  { %97 = shalt.err (!%p94_p2)
}
   0x9   :  { %s98_s18 = scalar_lea.vmem %s18_s10, 32  ;;  %p103_p4 = scmp.lt.s32.totalorder %s18_s10, %s18_s10 }
   0xa   :  { %p99_p3 = scmp.ne.s32.totalorder %s18_s10, %s98_s18  ;;  %p104_p5 = scmp.lt.s32.totalorder %s98_s18, %s98_s18 }
   0xc   :  { %p105_p6 = por %p104_p5, %p103_p4 }
   0xe   :  { %p106_p7 = pnand %p105_p6, %p99_p3 }
  0x10   :  { %109 = shalt.err (!%p106_p7)
}
  0x11   :  { %20 = dma.hbm_to_vmem [thread:$0]  %s227_s0, 32, %s18_s10, [#allocation3]  }
  0x12   :  { %154 = dma.done.wait [#allocation3], 32  }
  0x13   :  { %155 = vsyncadd [#allocation3], 4294967264  ;;  %vm28_vm0 = vcmask 516096   ;;  %v161_v0 = vmov 0.0   ;;  %vm33_vm1 = vcmask 517120   ;;  %s162_s0 = smov [#allocation5]  }
  0x14   :  { %29 = vst.msk [vmem:[#allocation5] sm:$0x1] %vm28_vm0, %v161_v0  ;;  %30 = vst.msk [vmem:[#allocation6] sm:$0x1] %vm28_vm0, %v161_v0  ;;  %v31_v1 = vld [vmem:[#allocation2] sm:$0x3] }
  0x15   :  { %v34_v2 = vsel %vm33_vm1, %v31_v1, 0.0  ;;  %v45_v3 = vmul.f32 %v31_v1, %v31_v1  ;;  %s61_s21 = sshll.u32 %s162_s0, 4  ;;  %s163_s22 = smov [#allocation6]   ;;  %s62_s21 = int_to_ptr.vmem [resolvable:$true] %s61_s21 }
  0x16   :  { %v35_v4 = vrot.slane %v34_v2, 4  ;;  %s71_s23 = sshll.u32 %s163_s22, 4  ;;  %s110_s24 = scalar_lea.vmem %s62_s21, 16  ;;  %s194_s23 = int_to_ptr.vmem [resolvable:$true] %s71_s23 }
  0x17   :  { %v46_v5 = vsel %vm33_vm1, %v45_v3, 0.0  ;;  %p111_p8 = scmp.ne.s32.totalorder %s62_s21, %s110_s24  ;;  %s114_s25 = scalar_lea.vmem %s62_s21, 32 }
  0x18   :  { %v36_v6 = vadd.f32 %v35_v4, %v34_v2  ;;  %v47_v7 = vrot.slane %v46_v5, 4  ;;  %p115_p9 = scmp.lt.s32.totalorder %s62_s21, %s62_s21  ;;  %p116_p10 = scmp.lt.s32.totalorder %s114_s25, %s110_s24 }
  0x1a   :  { %v37_v8 = vrot.slane %v36_v6, 2  ;;  %v48_v9 = vadd.f32 %v47_v7, %v46_v5  ;;  %p117_p11 = por %p116_p10, %p115_p9 }
  0x1b   :  { %v32_v14 = vld [vmem:[#allocation5] sm:$0x1]  ;;  %v44_v17 = vld [vmem:[#allocation6] sm:$0x1] }
  0x1c   :  { %v38_v10 = vadd.f32 %v37_v8, %v36_v6  ;;  %v49_v11 = vrot.slane %v48_v9, 2  ;;  %p118_p12 = pnand %p117_p11, %p111_p8 }
  0x1e   :  { %v39_v12 = vrot.slane %v38_v10, 1  ;;  %v50_v13 = vadd.f32 %v49_v11, %v48_v9 }
  0x20   :  { %v40_v15 = vadd.f32 %v39_v12, %v38_v10  ;;  %v51_v16 = vrot.slane %v50_v13, 1 }
  0x22   :  { %v41_v18 = vadd.f32 %v40_v15, %v32_v14  ;;  %v52_v19 = vadd.f32 %v51_v16, %v50_v13 }
  0x24   :  { %43 = vst.msk [vmem:[#allocation5] sm:$0x1] %vm28_vm0, %v41_v18  ;;  %v53_v20 = vadd.f32 %v52_v19, %v44_v17 }
  0x25   :  { %121 = shalt.err (!%p118_p12)
}
  0x26   :  { %s122_s28 = scalar_lea.hbm %s228_s1, 16 }
  0x27   :  { %p123_p13 = scmp.ne.s32.totalorder %s228_s1, %s122_s28  ;;  %p126_p0 = scmp.lt.u32.totalorder %s122_s28, %s228_s1 }
  0x29   :  { %p128_p1 = pnand %p126_p0, %p123_p13 }
  0x2b   :  { %131 = shalt.err (!%p128_p1)
}
  0x2c   :  { %64 = dma.vmem_to_hbm [thread:$0]  %s62_s21, 16, %s228_s1, [#allocation4]   ;;  %54 = vst.msk [vmem:[#allocation6] sm:$0x1] %vm28_vm0, %v53_v20 }
  0x2d   :  { %s132_s7 = scalar_lea.vmem %s194_s23, 16  ;;  %s136_s8 = scalar_lea.vmem %s194_s23, 32 }
  0x2e   :  { %p133_p2 = scmp.ne.s32.totalorder %s194_s23, %s132_s7  ;;  %p137_p3 = scmp.lt.s32.totalorder %s194_s23, %s194_s23 }
  0x2f   :  { %p138_p4 = scmp.lt.s32.totalorder %s136_s8, %s132_s7 }
  0x31   :  { %p139_p5 = por %p138_p4, %p137_p3 }
  0x33   :  { %p140_p6 = pnand %p139_p5, %p133_p2 }
  0x35   :  { %143 = shalt.err (!%p140_p6)
}
  0x36   :  { %s144_s11 = scalar_lea.hbm %s229_s2, 16 }
  0x37   :  { %p145_p7 = scmp.ne.s32.totalorder %s229_s2, %s144_s11  ;;  %p148_p8 = scmp.lt.u32.totalorder %s144_s11, %s229_s2 }
  0x39   :  { %p150_p9 = pnand %p148_p8, %p145_p7 }
  0x3b   :  { %153 = shalt.err (!%p150_p9)
}
  0x3c   :  { %74 = dma.vmem_to_hbm [thread:$0]  %s194_s23, 16, %s229_s2, [#allocation7]  }
  0x3d   :  { %156 = dma.done.wait [#allocation4], 16  }
  0x3e   :  { %157 = vsyncadd [#allocation4], 4294967280 }
  0x3f   :  { %158 = dma.done.wait [#allocation7], 16  }
  0x40   :  { %159 = vsyncadd [#allocation7], 4294967280 }
  0x41   :  { %81 = vsyncpa [#allocation3], 1 }
  0x42   :  { %82 = vsyncpa [#allocation4], 1 }
  0x43   :  { %83 = vsyncpa [#allocation7], 1 }

</bundles_post_ra>
